<compile_context>
chip_gen: v5e
topology: v5e:2x2
jax: 0.10.0
libtpu: 0.0.40
codegen_flags: <defaults>
</compile_context>

<pallas_src>
import numpy as np
import jax
import jax.numpy as jnp
from jax import lax
from jax.experimental import pallas as pl
from jax.experimental.pallas import tpu as pltpu

# MXU operand dtype (feedback: bf16 on v6e/v7x; epilogue/stats stay f32 for v5e).
MXU_DTYPE = jnp.bfloat16
_BN_EPS = 1e-5
_LANES = 128


def _round_up(n, m):
    return ((n + m - 1) // m) * m


def _pick_divisor(n, target):
    """Largest divisor of n that is <= target (>= 1)."""
    d = max(1, min(n, target))
    while n % d:
        d -= 1
    return d


# ---------------------------- bilinear upsample ----------------------------

def _interp_matrix(out_size, in_size):
    """align_corners=True linear interpolation matrix [out_size, in_size]."""
    A = np.zeros((out_size, in_size), dtype=np.float32)
    if out_size == 1 or in_size == 1:
        A[:, 0] = 1.0
        return jnp.asarray(A)
    scale = (in_size - 1) / (out_size - 1)
    for o in range(out_size):
        src = o * scale
        i0 = min(int(np.floor(src)), in_size - 1)
        i1 = min(i0 + 1, in_size - 1)
        f = src - i0
        A[o, i0] += 1.0 - f
        A[o, i1] += f
    return jnp.asarray(A)


def _upsample_kernel(x_ref, ah_ref, awt_ref, o_ref):
    # Batched bilinear upsample of [gb, H, W] planes: out[g] = Ah @ x[g] @ Aw^T.
    x = x_ref[...]                                        # [gb, H, W] f32
    gb, H, W = x.shape
    awt = awt_ref[...]                                    # [W, Wo]
    ah = ah_ref[...]                                      # [Ho, H]
    # W-direction pass as one 2-D matmul over all planes/rows (lane dim = Wo).
    t = jnp.dot(x.reshape(gb * H, W), awt,
                preferred_element_type=jnp.float32).reshape(gb, H, awt.shape[1])
    # H-direction pass as a batched matmul (no in-kernel transpose needed).
    ahb = jnp.broadcast_to(ah, (gb,) + ah.shape)          # [gb, Ho, H]
    o_ref[...] = lax.dot_general(ahb, t, (((2,), (1,)), ((0,), (0,))),
                                 preferred_element_type=jnp.float32)


def upsample_bilinear_x2(x):
    """nn.Upsample(scale_factor=2, mode='bilinear', align_corners=True), NCHW."""
    N, C, H, W = x.shape
    Ho, Wo = 2 * H, 2 * W
    Ah = _interp_matrix(Ho, H)                            # [Ho, H]
    AwT = _interp_matrix(Wo, W).T                         # [W, Wo]
    G = N * C
    gb = _pick_divisor(G, 64)                             # planes per grid step
    xf = x.reshape(G, H, W).astype(jnp.float32)
    out = pl.pallas_call(
        _upsample_kernel,
        out_shape=jax.ShapeDtypeStruct((G, Ho, Wo), jnp.float32),
        grid=(G // gb,),
        in_specs=[
            pl.BlockSpec((gb, H, W), lambda g: (g, 0, 0)),
            pl.BlockSpec((Ho, H), lambda g: (0, 0)),      # resident
            pl.BlockSpec((W, Wo), lambda g: (0, 0)),      # resident
        ],
        out_specs=pl.BlockSpec((gb, Ho, Wo), lambda g: (g, 0, 0)),
        compiler_params=pltpu.CompilerParams(dimension_semantics=("parallel",)),
    )(xf, Ah, AwT)
    return out.reshape(N, C, Ho, Wo)


# ---------------------------- fused 3x3 conv (NHWC) ----------------------------

def _pack_weight(w_oihw, cin_pad, cout_pad):
    """[Cout, Cin, 3, 3] -> [9, cin_pad, cout_pad] tap-major, zero-padded, bf16."""
    co, ci, kh, kw = w_oihw.shape
    wt = jnp.transpose(w_oihw, (2, 3, 1, 0)).reshape(kh * kw, ci, co)
    wt = jnp.pad(wt, ((0, 0), (0, cin_pad - ci), (0, cout_pad - co)))
    return wt.astype(MXU_DTYPE)


def _shifted_row_map(dy):
    # Block size along the padded-H axis is 1, so the block index IS the
    # padded row index: grid step h reads padded rows h, h+1, h+2.
    return lambda h: (0, h + dy, 0, 0)


def _make_conv_kernel(n_in, n_rows, width, cout_pad):
    """Fused 3x3 conv body: one output image-row (all batch images) per step.

    Refs (in order): for each logical input i: three [n_rows,1,W+2,Ci] views
    (dy = 0,1,2) of the spatially padded activation; then each packed weight
    [9,Ci,cout_pad] (resident); then outputs: raw conv row [n_rows,1,W,cout_pad]
    (f32, pre-BN, bias-free) and per-step BN partials [1,2,cout_pad].
    The conv bias is dropped: it cancels exactly under training-mode BatchNorm.
    """
    def kernel(*refs):
        x_refs = refs[:3 * n_in]
        w_refs = refs[3 * n_in:4 * n_in]
        o_ref = refs[4 * n_in]
        stat_ref = refs[4 * n_in + 1]
        acc = jnp.zeros((n_rows * width, cout_pad), jnp.float32)
        for i in range(n_in):
            w_all = w_refs[i]
            for dy in range(3):
                xr = x_refs[3 * i + dy][:, 0]                 # [n_rows, W+2, Ci]
                for dx in range(3):
                    xs = xr[:, dx:dx + width, :].reshape(n_rows * width, -1)
                    acc = acc + jnp.dot(xs, w_all[dy * 3 + dx],
                                        preferred_element_type=jnp.float32)
        o_ref[...] = acc.reshape(n_rows, 1, width, cout_pad)
        s1 = jnp.sum(acc, axis=0, keepdims=True)              # [1, cout_pad]
        s2 = jnp.sum(acc * acc, axis=0, keepdims=True)
        stat_ref[...] = jnp.concatenate([s1, s2], axis=0)[None]
    return kernel


def conv3x3_raw_nhwc(inputs, packed_weights, cout_pad):
    """3x3 conv, padding=1, over NHWC inputs that are logically channel-concat'd.

    The concat is fused away: each input tensor gets its own weight slice and
    all taps accumulate into one f32 accumulator. Returns the raw (pre-BN)
    lane-padded conv output [N,H,W,cout_pad] and per-row BN partial sums.
    """
    N, H, W, _ = inputs[0].shape
    Wp = W + 2
    n_in = len(inputs)

    args, in_specs = [], []
    for i in range(n_in):
        ci = inputs[i].shape[-1]
        xp = jnp.pad(inputs[i], ((0, 0), (1, 1), (1, 1), (0, 0))).astype(MXU_DTYPE)
        for dy in range(3):
            args.append(xp)  # same HBM array, three row-shifted views (no copies)
            in_specs.append(pl.BlockSpec((N, 1, Wp, ci), _shifted_row_map(dy)))
    for i in range(n_in):
        args.append(packed_weights[i])
        in_specs.append(
            pl.BlockSpec((9,) + packed_weights[i].shape[1:], lambda h: (0, 0, 0)))

    out_shapes = (
        jax.ShapeDtypeStruct((N, H, W, cout_pad), jnp.float32),
        jax.ShapeDtypeStruct((H, 2, cout_pad), jnp.float32),
    )
    out_specs = (
        pl.BlockSpec((N, 1, W, cout_pad), lambda h: (0, h, 0, 0)),
        pl.BlockSpec((1, 2, cout_pad), lambda h: (h, 0, 0)),
    )
    # Working set per step (double-buffered): 3*n_in thin input rows + one
    # lane-dense output row + resident weights -> re-derive against v7x's
    # 64 MiB (32 MiB scoped default) when scaling N/W/C up.
    return pl.pallas_call(
        _make_conv_kernel(n_in, N, W, cout_pad),
        out_shape=out_shapes,
        grid=(H,),
        in_specs=in_specs,
        out_specs=out_specs,
        compiler_params=pltpu.CompilerParams(dimension_semantics=("parallel",)),
    )(*args)


# ---------------------------- BatchNorm finalize + apply ----------------------------

def _bn_scale_shift(stats, gamma, beta, count, cpad):
    """Fold partial (sum, sum-sq) into per-channel scale/shift (training-mode BN)."""
    # TODO(synk): for very large N*H*W a Welford-style combine is preferable to
    # E[y^2] - E[y]^2; f32 sums are fine at these sizes.
    s = jnp.sum(stats, axis=0)                                # [2, cpad]
    mean = s[0] / count
    var = jnp.maximum(s[1] / count - mean * mean, 0.0)
    g = jnp.pad(gamma.astype(jnp.float32), (0, cpad - gamma.shape[0]),
                constant_values=1.0)
    b = jnp.pad(beta.astype(jnp.float32), (0, cpad - beta.shape[0]))
    scale = g * lax.rsqrt(var + _BN_EPS)
    shift = b - mean * scale
    return scale.reshape(1, 1, cpad), shift.reshape(1, 1, cpad)


def _bn_relu_kernel(y_ref, scale_ref, shift_ref, o_ref):
    # One FMA + max per element; scale/shift already fold mean/var/gamma/beta.
    o_ref[...] = jnp.maximum(
        y_ref[...] * scale_ref[...] + shift_ref[...], 0.0).astype(o_ref.dtype)


def bn_relu_apply(y_raw, scale, shift, out_dtype):
    """Tiled elementwise normalize + ReLU over [N, H, W, Cpad]."""
    N, H, W, Cp = y_raw.shape
    R = N * H
    yr = y_raw.reshape(R, W, Cp)
    tb = _pick_divisor(R, max(8, (1 << 20) // (W * Cp * 4)))  # ~1 MiB row tiles
    out = pl.pallas_call(
        _bn_relu_kernel,
        out_shape=jax.ShapeDtypeStruct((R, W, Cp), out_dtype),
        grid=(R // tb,),
        in_specs=[
            pl.BlockSpec((tb, W, Cp), lambda i: (i, 0, 0)),
            pl.BlockSpec((1, 1, Cp), lambda i: (0, 0, 0)),
            pl.BlockSpec((1, 1, Cp), lambda i: (0, 0, 0)),
        ],
        out_specs=pl.BlockSpec((tb, W, Cp), lambda i: (i, 0, 0)),
        compiler_params=pltpu.CompilerParams(dimension_semantics=("parallel",)),
    )(yr, scale, shift)
    return out.reshape(N, H, W, Cp)


# ---------------------------- Up.forward ----------------------------

def up_forward(x1, x2, params):
    """Forward of Up(in_channels=C1+C2, out_channels, bilinear=True)."""
    N, C1, H1, W1 = x1.shape
    _, C2, H2, W2 = x2.shape
    mid = params["w1"].shape[0]
    cout = params["w2"].shape[0]
    cp1 = _round_up(mid, _LANES)
    cp2 = _round_up(cout, _LANES)

    # 1) bilinear x2 upsample (Pallas, batched planes) + F.pad to x2's size.
    x1u = upsample_bilinear_x2(x1)                            # [N, C1, 2H1, 2W1]
    diffY, diffX = H2 - 2 * H1, W2 - 2 * W1
    # TODO(synk): negative diffs (cropping) of F.pad are not handled; for the
    # scale-2 UNet skip connections diffY/diffX >= 0.
    x1u = jnp.pad(x1u, ((0, 0), (0, 0),
                        (diffY // 2, diffY - diffY // 2),
                        (diffX // 2, diffX - diffX // 2)))

    # 2) NHWC (channels on lanes) end-to-end through the DoubleConv.
    x2n = jnp.transpose(x2, (0, 2, 3, 1)).astype(jnp.float32)
    x1n = jnp.transpose(x1u, (0, 2, 3, 1))

    # 3) conv1: concat([x2, x1u], channel) fused away by splitting w1; conv
    #    bias b1/b2 is dropped (cancels exactly under training-mode BN).
    w1a = _pack_weight(params["w1"][:, :C2], C2, cp1)
    w1b = _pack_weight(params["w1"][:, C2:], C1, cp1)
    y1_raw, st1 = conv3x3_raw_nhwc([x2n, x1n], [w1a, w1b], cp1)
    scale1, shift1 = _bn_scale_shift(st1, params["g1"], params["be1"],
                                     N * H2 * W2, cp1)
    a1 = bn_relu_apply(y1_raw, scale1, shift1, MXU_DTYPE)     # bf16, [N,H,W,cp1]

    # 4) conv2 consumes the lane-padded activation directly (padded channels
    #    are exactly zero and their weight rows are zero).
    w2p = _pack_weight(params["w2"], cp1, cp2)
    y2_raw, st2 = conv3x3_raw_nhwc([a1], [w2p], cp2)
    scale2, shift2 = _bn_scale_shift(st2, params["g2"], params["be2"],
                                     N * H2 * W2, cp2)
    a2 = bn_relu_apply(y2_raw, scale2, shift2, jnp.float32)   # f32, [N,H,W,cp2]

    return jnp.transpose(a2[..., :cout], (0, 3, 1, 2))        # back to NCHW


# ---------------------------- pure-JAX reference ----------------------------

def _ref_conv_bn_relu(x, w, b, g, be):
    y = lax.conv_general_dilated(
        x, w, window_strides=(1, 1), padding=((1, 1), (1, 1)),
        dimension_numbers=("NCHW", "OIHW", "NCHW"))
    y = y + b[None, :, None, None]
    mean = y.mean(axis=(0, 2, 3), keepdims=True)
    var = ((y - mean) ** 2).mean(axis=(0, 2, 3), keepdims=True)
    yhat = (y - mean) * lax.rsqrt(var + _BN_EPS)
    return jnp.maximum(yhat * g[None, :, None, None] + be[None, :, None, None], 0.0)


def _ref_up_forward(x1, x2, params):
    N, C, H, W = x1.shape
    Ah = _interp_matrix(2 * H, H)
    Aw = _interp_matrix(2 * W, W)
    x1u = jnp.einsum("oh,nchw,pw->ncop", Ah, x1.astype(jnp.float32), Aw)
    H2, W2 = x2.shape[2], x2.shape[3]
    diffY, diffX = H2 - x1u.shape[2], W2 - x1u.shape[3]
    x1u = jnp.pad(x1u, ((0, 0), (0, 0),
                        (diffY // 2, diffY - diffY // 2),
                        (diffX // 2, diffX - diffX // 2)))
    x = jnp.concatenate([x2.astype(jnp.float32), x1u], axis=1)
    y = _ref_conv_bn_relu(x, params["w1"], params["b1"], params["g1"], params["be1"])
    y = _ref_conv_bn_relu(y, params["w2"], params["b2"], params["g2"], params["be2"])
    return y


# ---------------------------- main ----------------------------

if __name__ == "__main__":
    key = jax.random.PRNGKey(0)
    ks = jax.random.split(key, 10)

    # x1 comes from the deeper level (half spatial res), x2 is the skip.
    N, C1, H1, W1 = 2, 4, 8, 8
    C2, H2, W2 = 4, 16, 16
    in_channels = C1 + C2          # 8
    out_channels = 4
    mid_channels = in_channels // 2  # 4 (bilinear=True path)

    x1 = jax.random.normal(ks[0], (N, C1, H1, W1), jnp.float32)
    x2 = jax.random.normal(ks[1], (N, C2, H2, W2), jnp.float32)

    params = dict(
        w1=0.1 * jax.random.normal(ks[2], (mid_channels, in_channels, 3, 3), jnp.float32),
        b1=0.1 * jax.random.normal(ks[3], (mid_channels,), jnp.float32),
        g1=1.0 + 0.1 * jax.random.normal(ks[4], (mid_channels,), jnp.float32),
        be1=0.1 * jax.random.normal(ks[5], (mid_channels,), jnp.float32),
        w2=0.1 * jax.random.normal(ks[6], (out_channels, mid_channels, 3, 3), jnp.float32),
        b2=0.1 * jax.random.normal(ks[7], (out_channels,), jnp.float32),
        g2=1.0 + 0.1 * jax.random.normal(ks[8], (out_channels,), jnp.float32),
        be2=0.1 * jax.random.normal(ks[9], (out_channels,), jnp.float32),
    )

    out = jax.block_until_ready(up_forward(x1, x2, params))
    assert out.shape == (N, out_channels, H2, W2), out.shape

    ref = jax.block_until_ready(_ref_up_forward(x1, x2, params))
    out_np, ref_np = np.asarray(out), np.asarray(ref)
    # bf16 MXU operands (f32 accumulation / BN statistics) give ~1e-2-scale
    # absolute differences on the unit-variance BN-normalized outputs.
    assert float(np.mean(np.abs(out_np - ref_np))) < 2.5e-2
    np.testing.assert_allclose(out_np, ref_np, atol=1e-1, rtol=1e-1)

    print("KERNEL_OK")
</pallas_src>

<mosaic_0001>
module attributes {stable_mosaic.version = 11 : i64} {
  func.func @_upsample_kernel(%arg0: i32, %arg1: memref<8x8x8xf32, #tpu.memory_space<vmem>>, %arg2: memref<16x8xf32, #tpu.memory_space<vmem>>, %arg3: memref<8x16xf32, #tpu.memory_space<vmem>>, %arg4: memref<8x16x16xf32, #tpu.memory_space<vmem>>) attributes {dimension_semantics = [#tpu.dimension_semantics<parallel>], iteration_bounds = array<i64: 1>, scalar_prefetch = 0 : i64, scratch_operands = 0 : i64, tpu.core_type = #tpu.core_type<tc>, window_params = [{transform_indices = @transform_0, window_bounds = array<i64: 8, 8, 8>}, {pipeline_mode = #tpu.pipeline_mode<synchronous>, transform_indices = @transform_1, window_bounds = array<i64: 16, 8>}, {pipeline_mode = #tpu.pipeline_mode<synchronous>, transform_indices = @transform_2, window_bounds = array<i64: 8, 16>}, {transform_indices = @transform_3, window_bounds = array<i64: 8, 16, 16>}]} {
    %c0 = arith.constant 0 : index
    %c0_0 = arith.constant 0 : index
    %c0_1 = arith.constant 0 : index
    %0 = vector.load %arg1[%c0, %c0_0, %c0_1] : memref<8x8x8xf32, #tpu.memory_space<vmem>>, vector<8x8x8xf32>
    %c0_2 = arith.constant 0 : index
    %c0_3 = arith.constant 0 : index
    %1 = vector.load %arg3[%c0_2, %c0_3] : memref<8x16xf32, #tpu.memory_space<vmem>>, vector<8x16xf32>
    %c0_4 = arith.constant 0 : index
    %c0_5 = arith.constant 0 : index
    %2 = vector.load %arg2[%c0_4, %c0_5] : memref<16x8xf32, #tpu.memory_space<vmem>>, vector<16x8xf32>
    %3 = vector.shape_cast %0 : vector<8x8x8xf32> to vector<64x8xf32>
    %cst = arith.constant dense<0.000000e+00> : vector<64x16xf32>
    %4 = tpu.matmul %3, %1, %cst {dimension_numbers = #tpu.dot_dimension_numbers<[1], [0], [0], [1], [0, 0, 1, 1], [], []>} : vector<64x8xf32>, vector<8x16xf32>, vector<64x16xf32> -> vector<64x16xf32>
    %5 = vector.shape_cast %4 : vector<64x16xf32> to vector<8x8x16xf32>
    %6 = vector.shape_cast %2 : vector<16x8xf32> to vector<1x16x8xf32>
    %7 = vector.broadcast %6 : vector<1x16x8xf32> to vector<8x16x8xf32>
    %cst_6 = arith.constant dense<0.000000e+00> : vector<8x16x16xf32>
    %8 = tpu.matmul %7, %5, %cst_6 {dimension_numbers = #tpu.dot_dimension_numbers<[2], [1], [1], [2], [0, 0, 0, 1, 1, 2], [0], [0]>} : vector<8x16x8xf32>, vector<8x8x16xf32>, vector<8x16x16xf32> -> vector<8x16x16xf32>
    %c0_7 = arith.constant 0 : index
    %c0_8 = arith.constant 0 : index
    %c0_9 = arith.constant 0 : index
    %9 = vector.load %arg4[%c0_7, %c0_8, %c0_9] : memref<8x16x16xf32, #tpu.memory_space<vmem>>, vector<8x16x16xf32>
    tpu.vector_store %arg4[%c0_7, %c0_8, %c0_9], %8 {strides = array<i32>} : memref<8x16x16xf32, #tpu.memory_space<vmem>>, vector<8x16x16xf32>,
    return
  }
  func.func @transform_0(%arg0: i32) -> (i32, i32, i32) {
    %c0_i32 = arith.constant 0 : i32
    %c0_i32_0 = arith.constant 0 : i32
    %c0_i32_1 = arith.constant 0 : i32
    return %arg0, %c0_i32, %c0_i32_0 : i32, i32, i32
  }
  func.func @transform_1(%arg0: i32) -> (i32, i32) {
    %c0_i32 = arith.constant 0 : i32
    %c0_i32_0 = arith.constant 0 : i32
    %c0_i32_1 = arith.constant 0 : i32
    return %c0_i32, %c0_i32_0 : i32, i32
  }
  func.func @transform_2(%arg0: i32) -> (i32, i32) {
    %c0_i32 = arith.constant 0 : i32
    %c0_i32_0 = arith.constant 0 : i32
    %c0_i32_1 = arith.constant 0 : i32
    return %c0_i32, %c0_i32_0 : i32, i32
  }
  func.func @transform_3(%arg0: i32) -> (i32, i32, i32) {
    %c0_i32 = arith.constant 0 : i32
    %c0_i32_0 = arith.constant 0 : i32
    %c0_i32_1 = arith.constant 0 : i32
    return %arg0, %c0_i32, %c0_i32_0 : i32, i32, i32
  }
}

</mosaic_0001>

<bundles_post_ra>
// kernel: tpu_custom_call.1
= control target key start
LH: loop header
LB: loop body
LE: loop exit
PB: predicated region body
PF: predicated region fallthrough
CT: control target
= control target key end

     0   :  { %8 = vsyncpa [#allocation3], 0  ;;  %s500_s0 = inlined_call_operand.hbm [shape: f32[8,8,8], index: 0, kind: input, shape index: {}]   ;;  %s501_s1 = inlined_call_operand.vmem [shape: f32[16,8], index: 1, kind: input, shape index: {}]   ;;  %s502_s2 = inlined_call_operand.vmem [shape: f32[8,16], index: 2, kind: input, shape index: {}]   ;;  %s503_s3 = inlined_call_operand.hbm [shape: f32[8,16,16], index: 3, kind: output, shape index: {}]  }
   0x1   :  { %9 = vsyncpa [#allocation4], 0  ;;  %s14_s14 = sshll.u32 %s500_s0, 4  ;;  %s415_s15 = smov [#allocation2]   ;;  %s15_s14 = int_to_ptr.hbm [resolvable:$true] %s14_s14 }
   0x2   :  { %s16_s16 = sshll.u32 %s415_s15, 4  ;;  %s416_s17 = smov 128   ;;  %s17_s16 = int_to_ptr.vmem [resolvable:$true] %s16_s16 }
   0x3   :  { %s417_s18 = smov 8  }
   0x4   :  { %22 = dma.hbm_to_vmem [thread:$0]  %s15_s14, 1024, %s17_s16, [#allocation3], %s416_s17, %s416_s17, %s417_s18  }
   0x5   :  { %411 = dma.done.wait [#allocation3], 1024  }
   0x6   :  { %412 = vsyncadd [#allocation3], 4294966272  ;;  %vm42_vm0 = vcmask 64512   ;;  %v39_v0 = vld [vmem:[%s502_s2] sm:$0xff]  ;;  %v37_v2 = vld [vmem:[#allocation2 + $0x30] sm:$0xff]  ;;  %vm298_vm1 = vcmask 130048  }
   0x7   :  { %v31_v1 = vld [vmem:[#allocation2] sm:$0xff]  ;;  %82 = vmatpush.msra.mxu0 %v39_v0  ;;  %358 = vmatpush.msra.mxu3 %v39_v0  ;;  %v32_v3 = vld [vmem:[#allocation2 + $0x8] sm:$0xff]  ;;  %v38_v4 = vld [vmem:[#allocation2 + $0x38] sm:$0xff]  ;;  %s321_s26 = sshll.u32 %s503_s3, 4  ;;  %s322_s26 = int_to_ptr.hbm [resolvable:$true] %s321_s26 }
   0x8   :  { %334 = vmatmul.msk.f32.vlgmr.msra.gmra.mxu0 %vm42_vm0, %v31_v1  ;;  %340 = vmatmul.msk.f32.vlgmr.msra.gmra.mxu3 %vm42_vm0, %v37_v2  ;;  %v33_v5 = vld [vmem:[#allocation2 + $0x10] sm:$0xff]  ;;  %v34_v6 = vld [vmem:[#allocation2 + $0x18] sm:$0xff]  ;;  %v35_v7 = vld [vmem:[#allocation2 + $0x20] sm:$0xff] }
   0x9   :  { %v36_v8 = vld [vmem:[#allocation2 + $0x28] sm:$0xff]  ;;  %v40_v10 = vld [vmem:[%s501_s1] sm:$0xff] }
   0xa   :  { %v41_v12 = vld [vmem:[%s501_s1 + $0x8] sm:$0xff]  ;;  %s418_s1 = smov [#allocation5]  }
   0xb   :  { %s319_s23 = sshll.u32 %s418_s1, 4  ;;  %s320_s23 = int_to_ptr.vmem [resolvable:$true] %s319_s23 }
  0x10   :  { %335 = vmatmul.msk.f32.gmra.mxu0 %vm42_vm0, %v32_v3  ;;  %341 = vmatmul.msk.f32.gmra.mxu3 %vm42_vm0, %v38_v4 }
  0x18   :  { %336 = vmatmul.msk.f32.gmra.mxu0 %vm42_vm0, %v33_v5 }
  0x20   :  { %337 = vmatmul.msk.f32.gmra.mxu0 %vm42_vm0, %v34_v6 }
  0x28   :  { %338 = vmatmul.msk.f32.gmra.mxu0 %vm42_vm0, %v35_v7 }
  0x30   :  { %339 = vmatmul.msk.f32.gmra.mxu0 %vm42_vm0, %v36_v8 }
  0x85   :  { %v84_v9 = vpop.f32.mrf.mxu0 }
  0x86   :  { %129 = vmatpush.msra.mxu1 %v84_v9 }
  0x87   :  { %342 = vmatmul.msk.f32.vlgmr.msra.gmra.mxu1 %vm42_vm0, %v40_v10 }
  0x8b   :  { %v102_v14 = vpop.f32.mrf.mxu3 }
  0x8d   :  { %v87_v11 = vpop.f32.mrf.mxu0 }
  0x8e   :  { %152 = vmatpush.msra.mxu2 %v87_v11 }
  0x8f   :  { %344 = vmatmul.msk.f32.vlgmr.msra.gmra.mxu2 %vm42_vm0, %v40_v10  ;;  %343 = vmatmul.msk.f32.gmra.mxu1 %vm42_vm0, %v41_v12 }
  0x93   :  { %v105_v17 = vpop.f32.mrf.mxu3 }
  0x95   :  { %v90_v13 = vpop.f32.mrf.mxu0 }
  0x96   :  { %175 = vmatpush.msrb.mxu3 %v90_v13 }
  0x97   :  { %345 = vmatmul.msk.f32.gmra.mxu2 %vm42_vm0, %v41_v12  ;;  %346 = vmatmul.msk.f32.vlgmr.msrb.gmra.mxu3 %vm42_vm0, %v40_v10 }
  0x9d   :  { %v93_v15 = vpop.f32.mrf.mxu0 }
  0x9e   :  { %198 = vmatpush.msrb.mxu1 %v93_v15 }
  0x9f   :  { %347 = vmatmul.msk.f32.gmra.mxu3 %vm42_vm0, %v41_v12  ;;  %348 = vmatmul.msk.f32.vlgmr.msrb.gmra.mxu1 %vm42_vm0, %v40_v10 }
  0xa0   :  { %267 = vmatpush.msra.mxu1 %v102_v14 }
  0xa5   :  { %v96_v16 = vpop.f32.mrf.mxu0 }
  0xa6   :  { %221 = vmatpush.msrb.mxu2 %v96_v16 }
  0xa7   :  { %350 = vmatmul.msk.f32.vlgmr.msrb.gmra.mxu2 %vm42_vm0, %v40_v10  ;;  %349 = vmatmul.msk.f32.gmra.mxu1 %vm42_vm0, %v41_v12 }
  0xa8   :  { %290 = vmatpush.msra.mxu2 %v105_v17 }
  0xad   :  { %v99_v18 = vpop.f32.mrf.mxu0 }
  0xae   :  { %244 = vmatpush.msra.mxu3 %v99_v18 }
  0xaf   :  { %351 = vmatmul.msk.f32.gmra.mxu2 %vm42_vm0, %v41_v12  ;;  %352 = vmatmul.msk.f32.vlgmr.msra.gmra.mxu3 %vm42_vm0, %v40_v10 }
  0xb0   :  { %354 = vmatmul.msk.f32.vlgmr.msra.gmra.mxu1 %vm42_vm0, %v40_v10 }
  0xb7   :  { %356 = vmatmul.msk.f32.vlgmr.msra.gmra.mxu2 %vm42_vm0, %v40_v10  ;;  %353 = vmatmul.msk.f32.gmra.mxu3 %vm42_vm0, %v41_v12 }
  0xb8   :  { %355 = vmatmul.msk.f32.gmra.mxu1 %vm42_vm0, %v41_v12 }
  0xbf   :  { %357 = vmatmul.msk.f32.gmra.mxu2 %vm42_vm0, %v41_v12 }
 0x104   :  { %v131_v19 = vpop.f32.mrf.mxu1 }
 0x105   :  { %299 = vst.msk [vmem:[#allocation5] sm:$0xff] %vm298_vm1, %v131_v19 }
 0x10c   :  { %v134_v20 = vpop.f32.mrf.mxu1 }
 0x10d   :  { %300 = vst.msk [vmem:[#allocation5 + $0x8] sm:$0xff] %vm298_vm1, %v134_v20 }
 0x112   :  { %v154_v21 = vpop.f32.mrf.mxu2 }
 0x113   :  { %301 = vst.msk [vmem:[#allocation5 + $0x10] sm:$0xff] %vm298_vm1, %v154_v21 }
 0x11a   :  { %v157_v22 = vpop.f32.mrf.mxu2  ;;  %v177_v23 = vpop.f32.mrf.mxu3 }
 0x11b   :  { %302 = vst.msk [vmem:[#allocation5 + $0x18] sm:$0xff] %vm298_vm1, %v157_v22 }
 0x11c   :  { %303 = vst.msk [vmem:[#allocation5 + $0x20] sm:$0xff] %vm298_vm1, %v177_v23  ;;  %v200_v24 = vpop.f32.mrf.mxu1 }
 0x11d   :  { %305 = vst.msk [vmem:[#allocation5 + $0x30] sm:$0xff] %vm298_vm1, %v200_v24 }
 0x122   :  { %v180_v25 = vpop.f32.mrf.mxu3 }
 0x123   :  { %304 = vst.msk [vmem:[#allocation5 + $0x28] sm:$0xff] %vm298_vm1, %v180_v25 }
 0x124   :  { %v203_v26 = vpop.f32.mrf.mxu1 }
 0x125   :  { %306 = vst.msk [vmem:[#allocation5 + $0x38] sm:$0xff] %vm298_vm1, %v203_v26 }
 0x12a   :  { %v223_v27 = vpop.f32.mrf.mxu2 }
 0x12b   :  { %307 = vst.msk [vmem:[#allocation5 + $0x40] sm:$0xff] %vm298_vm1, %v223_v27 }
 0x12d   :  { %v269_v28 = vpop.f32.mrf.mxu1 }
 0x12e   :  { %311 = vst.msk [vmem:[#allocation5 + $0x60] sm:$0xff] %vm298_vm1, %v269_v28 }
 0x132   :  { %v226_v29 = vpop.f32.mrf.mxu2  ;;  %v246_v30 = vpop.f32.mrf.mxu3 }
 0x133   :  { %308 = vst.msk [vmem:[#allocation5 + $0x48] sm:$0xff] %vm298_vm1, %v226_v29 }
 0x134   :  { %309 = vst.msk [vmem:[#allocation5 + $0x50] sm:$0xff] %vm298_vm1, %v246_v30 }
 0x135   :  { %v272_v31 = vpop.f32.mrf.mxu1 }
 0x136   :  { %312 = vst.msk [vmem:[#allocation5 + $0x68] sm:$0xff] %vm298_vm1, %v272_v31 }
 0x13a   :  { %v292_v32 = vpop.f32.mrf.mxu2  ;;  %v249_v33 = vpop.f32.mrf.mxu3 }
 0x13b   :  { %313 = vst.msk [vmem:[#allocation5 + $0x70] sm:$0xff] %vm298_vm1, %v292_v32 }
 0x13c   :  { %310 = vst.msk [vmem:[#allocation5 + $0x58] sm:$0xff] %vm298_vm1, %v249_v33 }
 0x142   :  { %v295_v34 = vpop.f32.mrf.mxu2 }
 0x143   :  { %314 = vst.msk [vmem:[#allocation5 + $0x78] sm:$0xff] %vm298_vm1, %v295_v34 }
 0x144   :  { %327 = dma.vmem_to_hbm [thread:$0]  %s320_s23, 2048, %s322_s26, [#allocation4], %s416_s17, %s416_s17, %s417_s18  }
 0x145   :  { %413 = dma.done.wait [#allocation4], 2048  }
 0x146   :  { %414 = vsyncadd [#allocation4], 4294965248 }
 0x147   :  { %332 = vsyncpa [#allocation3], 1 }
 0x148   :  { %333 = vsyncpa [#allocation4], 1 }

</bundles_post_ra>
